<compile_context>
chip_gen: v7x
topology: tpu7x:2x2x1
jax: 0.10.0
libtpu: 0.0.40
codegen_flags: <defaults>
</compile_context>

<pallas_src>
import jax
import jax.numpy as jnp
from jax import lax
from jax.experimental import pallas as pl
from jax.experimental.pallas import tpu as pltpu


def _discriminator_kernel(x_ref, w1_ref, b1_ref, w2_ref, b2_ref, w3t_ref, b3_ref, o_ref):
    # In-kernel cast of the activations (no-op for the default f32 path).
    x = x_ref[...].astype(w1_ref.dtype)

    # Layer 1: Linear + ReLU (MXU matmul with f32 accumulation; bias/ReLU on VPU).
    h1 = jnp.dot(x, w1_ref[...], preferred_element_type=jnp.float32)
    h1 = jnp.maximum(h1 + b1_ref[...], 0.0)

    # Layer 2: Linear + ReLU.
    h2 = jnp.dot(h1.astype(w2_ref.dtype), w2_ref[...], preferred_element_type=jnp.float32)
    h2 = jnp.maximum(h2 + b2_ref[...], 0.0)

    # Layer 3, computed transposed: (O, tb) = w3t(O,H) . h2(tb,H)^T.
    # dot_general contracting both last dims == the flash-attention q.k^T pattern,
    # so no explicit transpose/reshape is ever materialized; the result is already
    # lane-dense for the [O, B] output.
    z_t = lax.dot_general(
        w3t_ref[...], h2.astype(w3t_ref.dtype),
        dimension_numbers=(((1,), (1,)), ((), ())),
        preferred_element_type=jnp.float32,
    )
    z_t = z_t + b3_ref[...]  # b3 is (O, 1): broadcast along lanes.

    # sigmoid(x) = 0.5 * tanh(0.5 * x) + 0.5  -- tanh lands on the EUP (free slot).
    o_ref[...] = (0.5 * jnp.tanh(0.5 * z_t) + 0.5).astype(o_ref.dtype)


def _pick_batch_tile(B, row_bytes, budget_bytes, cap=4096):
    """Largest multiple-of-128 batch tile that fits the VMEM tile budget."""
    if B <= 128:
        return B
    tb = max(128, min(cap, (budget_bytes // max(row_bytes, 1)) // 128 * 128))
    if B <= tb:
        return B
    # Best effort: prefer an even number of grid steps so v7x's two TensorCores
    # stay balanced under dimension_semantics=("parallel",).
    steps = pl.cdiv(B, tb)
    if steps > 1 and steps % 2 == 1:
        tb_even = ((pl.cdiv(B, steps + 1) + 127) // 128) * 128
        if tb_even >= 128 and pl.cdiv(B, tb_even) % 2 == 0:
            tb = tb_even
    return tb


def discriminator_forward(x, params, *, batch_tile=None, vmem_tile_budget_bytes=8 << 20):
    """x: [B, input_size]; params: dict of w1,b1,w2,b2,w3t,b3 (see layouts above)."""
    w1, b1, w2, b2, w3t, b3 = (params[k] for k in ("w1", "b1", "w2", "b2", "w3t", "b3"))
    B, I = x.shape
    H = w1.shape[1]
    O = w3t.shape[0]

    param_bytes = sum(int(a.size) * a.dtype.itemsize for a in (w1, b1, w2, b2, w3t, b3))

    if batch_tile is None:
        # Per-row pipelined traffic: double-buffered x tile in + [O, tb] f32 tile out.
        row_bytes = 2 * (I * x.dtype.itemsize + O * 4)
        budget = max(vmem_tile_budget_bytes - param_bytes, 1 << 20)
        tb = _pick_batch_tile(B, row_bytes, budget)
    else:
        # Explicit tile: keep it a multiple of 128 so the lane-dense output block
        # stays unmasked (or use the full batch if it already fits in one tile).
        tb = B if B <= batch_tile else max(128, (batch_tile // 128) * 128)

    grid = (pl.cdiv(B, tb),)
    vmem = pltpu.MemorySpace.VMEM

    def resident(shape):
        # Constant index_map -> block stays VMEM-resident across the batch loop;
        # Buffered(1) -> single buffer (no second, never-used pipeline buffer).
        return pl.BlockSpec(shape, lambda i: (0, 0), memory_space=vmem,
                            pipeline_mode=pl.Buffered(1))

    cost = pl.CostEstimate(
        flops=2 * B * (I * H + H * H + H * O),
        transcendentals=B * O,
        bytes_accessed=B * I * x.dtype.itemsize + param_bytes + B * O * 4,
    )

    out_t = pl.pallas_call(
        _discriminator_kernel,
        out_shape=jax.ShapeDtypeStruct((O, B), jnp.float32),
        grid=grid,
        in_specs=[
            pl.BlockSpec((tb, I), lambda i: (i, 0), memory_space=vmem),
            resident((I, H)),
            resident((1, H)),
            resident((H, H)),
            resident((1, H)),
            resident((O, H)),
            resident((O, 1)),
        ],
        out_specs=pl.BlockSpec((O, tb), lambda i: (0, i), memory_space=vmem),
        compiler_params=pltpu.CompilerParams(
            dimension_semantics=("parallel",),
            # 48 MiB: > v5e/v6e scoped defaults (16/32 MiB), < v7x's 64 MiB physical.
            vmem_limit_bytes=48 << 20,
        ),
        cost_estimate=cost,
    )(x, w1, b1, w2, b2, w3t, b3)

    # [O, B] -> [B, O]. For O == 1 this is a pure reshape (same memory order, free).
    return out_t.reshape(B, O) if O == 1 else out_t.T


def init_params(key, input_size, hidden_size, output_size, param_dtype=jnp.float32):
    """PyTorch-nn.Linear-style init (uniform +/- 1/sqrt(fan_in)).

    Weights are (optionally) cast to `param_dtype` ONCE here, so the forward pass
    never pays a wrapper-side astype pass; biases stay f32 (added post-accumulation).
    """
    ks = jax.random.split(key, 6)

    def linear_t(kw, kb, fan_in, fan_out):
        bound = 1.0 / (fan_in ** 0.5)
        w = jax.random.uniform(kw, (fan_in, fan_out), jnp.float32, -bound, bound)
        b = jax.random.uniform(kb, (1, fan_out), jnp.float32, -bound, bound)
        return w.astype(param_dtype), b

    w1, b1 = linear_t(ks[0], ks[1], input_size, hidden_size)
    w2, b2 = linear_t(ks[2], ks[3], hidden_size, hidden_size)

    # map3 stored in PyTorch's native [out, in] layout (w3t) so the kernel can emit a
    # lane-dense [O, B] result; bias stored as [O, 1] to match.
    bound3 = 1.0 / (hidden_size ** 0.5)
    w3t = jax.random.uniform(ks[4], (output_size, hidden_size), jnp.float32,
                             -bound3, bound3).astype(param_dtype)
    b3 = jax.random.uniform(ks[5], (output_size, 1), jnp.float32, -bound3, bound3)
    return {"w1": w1, "b1": b1, "w2": w2, "b2": b2, "w3t": w3t, "b3": b3}


def _reference_forward(x, p):
    h = jax.nn.relu(x @ p["w1"].astype(jnp.float32) + p["b1"])
    h = jax.nn.relu(h @ p["w2"].astype(jnp.float32) + p["b2"])
    z = h @ p["w3t"].astype(jnp.float32).T + p["b3"].T
    return 1.0 / (1.0 + jnp.exp(-z))


if __name__ == "__main__":
    key = jax.random.PRNGKey(0)
    k_x, k_p, k_x2 = jax.random.split(key, 3)

    batch, input_size, hidden_size, output_size = 8, 16, 32, 1
    x = jax.random.normal(k_x, (batch, input_size), jnp.float32)
    params = init_params(k_p, input_size, hidden_size, output_size)

    # Small-batch case (single grid step, blocks == full arrays).
    out = jax.block_until_ready(discriminator_forward(x, params))
    ref = _reference_forward(x, params)
    assert out.shape == (batch, output_size)
    assert jnp.allclose(out, ref, atol=1e-5, rtol=1e-5)

    # Larger batch: (a) auto tile (single fat tile at this feature width) and
    # (b) explicit 256-row tiles to exercise the multi-step grid with a partial
    # final tile (640 = 256 + 256 + 128) and the clipped lane-dense writeback.
    big_batch = 640
    x_big = jax.random.normal(k_x2, (big_batch, input_size), jnp.float32)
    ref_big = _reference_forward(x_big, params)

    out_auto = jax.block_until_ready(discriminator_forward(x_big, params))
    out_tiled = jax.block_until_ready(
        discriminator_forward(x_big, params, batch_tile=256)
    )
    assert out_auto.shape == (big_batch, output_size)
    assert out_tiled.shape == (big_batch, output_size)
    assert jnp.allclose(out_auto, ref_big, atol=1e-5, rtol=1e-5)
    assert jnp.allclose(out_tiled, ref_big, atol=1e-5, rtol=1e-5)

    print("KERNEL_OK")
</pallas_src>

<mosaic_0001>
module attributes {stable_mosaic.version = 11 : i64} {
  func.func @_discriminator_kernel(%arg0: i32, %arg1: memref<8x16xf32, #tpu.memory_space<vmem>>, %arg2: memref<16x32xf32, #tpu.memory_space<vmem>>, %arg3: memref<1x32xf32, #tpu.memory_space<vmem>>, %arg4: memref<32x32xf32, #tpu.memory_space<vmem>>, %arg5: memref<1x32xf32, #tpu.memory_space<vmem>>, %arg6: memref<1x32xf32, #tpu.memory_space<vmem>>, %arg7: memref<1x1xf32, #tpu.memory_space<vmem>>, %arg8: memref<1x8xf32, #tpu.memory_space<vmem>>) attributes {dimension_semantics = [#tpu.dimension_semantics<parallel>], iteration_bounds = array<i64: 1>, scalar_prefetch = 0 : i64, scratch_operands = 0 : i64, tpu.core_type = #tpu.core_type<tc>, window_params = [{transform_indices = @transform_0, window_bounds = array<i64: 8, 16>}, {pipeline_mode = #tpu.pipeline_mode<synchronous>, transform_indices = @transform_1, window_bounds = array<i64: 16, 32>}, {pipeline_mode = #tpu.pipeline_mode<synchronous>, transform_indices = @transform_2, window_bounds = array<i64: 1, 32>}, {pipeline_mode = #tpu.pipeline_mode<synchronous>, transform_indices = @transform_3, window_bounds = array<i64: 32, 32>}, {pipeline_mode = #tpu.pipeline_mode<synchronous>, transform_indices = @transform_4, window_bounds = array<i64: 1, 32>}, {pipeline_mode = #tpu.pipeline_mode<synchronous>, transform_indices = @transform_5, window_bounds = array<i64: 1, 32>}, {pipeline_mode = #tpu.pipeline_mode<synchronous>, transform_indices = @transform_6, window_bounds = array<i64: 1, 1>}, {transform_indices = @transform_7, window_bounds = array<i64: 1, 8>}]} {
    %c0 = arith.constant 0 : index
    %c0_0 = arith.constant 0 : index
    %0 = vector.load %arg1[%c0, %c0_0] : memref<8x16xf32, #tpu.memory_space<vmem>>, vector<8x16xf32>
    %c0_1 = arith.constant 0 : index
    %c0_2 = arith.constant 0 : index
    %1 = vector.load %arg2[%c0_1, %c0_2] : memref<16x32xf32, #tpu.memory_space<vmem>>, vector<16x32xf32>
    %cst = arith.constant dense<0.000000e+00> : vector<8x32xf32>
    %2 = tpu.matmul %0, %1, %cst {dimension_numbers = #tpu.dot_dimension_numbers<[1], [0], [0], [1], [0, 0, 1, 1], [], []>} : vector<8x16xf32>, vector<16x32xf32>, vector<8x32xf32> -> vector<8x32xf32>
    %c0_3 = arith.constant 0 : index
    %c0_4 = arith.constant 0 : index
    %3 = vector.load %arg3[%c0_3, %c0_4] : memref<1x32xf32, #tpu.memory_space<vmem>>, vector<1x32xf32>
    %4 = vector.broadcast %3 : vector<1x32xf32> to vector<8x32xf32>
    %5 = arith.addf %2, %4 : vector<8x32xf32>
    %cst_5 = arith.constant 0.000000e+00 : f32
    %6 = vector.broadcast %cst_5 : f32 to vector<8x32xf32>
    %7 = arith.maximumf %5, %6 : vector<8x32xf32>
    %c0_6 = arith.constant 0 : index
    %c0_7 = arith.constant 0 : index
    %8 = vector.load %arg4[%c0_6, %c0_7] : memref<32x32xf32, #tpu.memory_space<vmem>>, vector<32x32xf32>
    %cst_8 = arith.constant dense<0.000000e+00> : vector<8x32xf32>
    %9 = tpu.matmul %7, %8, %cst_8 {dimension_numbers = #tpu.dot_dimension_numbers<[1], [0], [0], [1], [0, 0, 1, 1], [], []>} : vector<8x32xf32>, vector<32x32xf32>, vector<8x32xf32> -> vector<8x32xf32>
    %c0_9 = arith.constant 0 : index
    %c0_10 = arith.constant 0 : index
    %10 = vector.load %arg5[%c0_9, %c0_10] : memref<1x32xf32, #tpu.memory_space<vmem>>, vector<1x32xf32>
    %11 = vector.broadcast %10 : vector<1x32xf32> to vector<8x32xf32>
    %12 = arith.addf %9, %11 : vector<8x32xf32>
    %cst_11 = arith.constant 0.000000e+00 : f32
    %13 = vector.broadcast %cst_11 : f32 to vector<8x32xf32>
    %14 = arith.maximumf %12, %13 : vector<8x32xf32>
    %c0_12 = arith.constant 0 : index
    %c0_13 = arith.constant 0 : index
    %15 = vector.load %arg6[%c0_12, %c0_13] : memref<1x32xf32, #tpu.memory_space<vmem>>, vector<1x32xf32>
    %cst_14 = arith.constant dense<0.000000e+00> : vector<1x8xf32>
    %16 = tpu.matmul %15, %14, %cst_14 {dimension_numbers = #tpu.dot_dimension_numbers<[1], [1], [0], [0], [0, 0, 1, 0], [], []>} : vector<1x32xf32>, vector<8x32xf32>, vector<1x8xf32> -> vector<1x8xf32>
    %c0_15 = arith.constant 0 : index
    %c0_16 = arith.constant 0 : index
    %17 = vector.load %arg7[%c0_15, %c0_16] : memref<1x1xf32, #tpu.memory_space<vmem>>, vector<1x1xf32>
    %18 = vector.broadcast %17 : vector<1x1xf32> to vector<1x8xf32>
    %19 = arith.addf %16, %18 : vector<1x8xf32>
    %cst_17 = arith.constant 5.000000e-01 : f32
    %20 = vector.broadcast %cst_17 : f32 to vector<1x8xf32>
    %21 = arith.mulf %20, %19 : vector<1x8xf32>
    %22 = math.tanh %21 : vector<1x8xf32>
    %cst_18 = arith.constant 5.000000e-01 : f32
    %23 = vector.broadcast %cst_18 : f32 to vector<1x8xf32>
    %24 = arith.mulf %23, %22 : vector<1x8xf32>
    %cst_19 = arith.constant 5.000000e-01 : f32
    %25 = vector.broadcast %cst_19 : f32 to vector<1x8xf32>
    %26 = arith.addf %24, %25 : vector<1x8xf32>
    %c0_20 = arith.constant 0 : index
    %c0_21 = arith.constant 0 : index
    %27 = vector.load %arg8[%c0_20, %c0_21] : memref<1x8xf32, #tpu.memory_space<vmem>>, vector<1x8xf32>
    tpu.vector_store %arg8[%c0_20, %c0_21], %26 {strides = array<i32>} : memref<1x8xf32, #tpu.memory_space<vmem>>, vector<1x8xf32>,
    return
  }
  func.func @transform_0(%arg0: i32) -> (i32, i32) {
    %c0_i32 = arith.constant 0 : i32
    %c0_i32_0 = arith.constant 0 : i32
    return %arg0, %c0_i32 : i32, i32
  }
  func.func @transform_1(%arg0: i32) -> (i32, i32) {
    %c0_i32 = arith.constant 0 : i32
    %c0_i32_0 = arith.constant 0 : i32
    %c0_i32_1 = arith.constant 0 : i32
    return %c0_i32, %c0_i32_0 : i32, i32
  }
  func.func @transform_2(%arg0: i32) -> (i32, i32) {
    %c0_i32 = arith.constant 0 : i32
    %c0_i32_0 = arith.constant 0 : i32
    %c0_i32_1 = arith.constant 0 : i32
    return %c0_i32, %c0_i32_0 : i32, i32
  }
  func.func @transform_3(%arg0: i32) -> (i32, i32) {
    %c0_i32 = arith.constant 0 : i32
    %c0_i32_0 = arith.constant 0 : i32
    %c0_i32_1 = arith.constant 0 : i32
    return %c0_i32, %c0_i32_0 : i32, i32
  }
  func.func @transform_4(%arg0: i32) -> (i32, i32) {
    %c0_i32 = arith.constant 0 : i32
    %c0_i32_0 = arith.constant 0 : i32
    %c0_i32_1 = arith.constant 0 : i32
    return %c0_i32, %c0_i32_0 : i32, i32
  }
  func.func @transform_5(%arg0: i32) -> (i32, i32) {
    %c0_i32 = arith.constant 0 : i32
    %c0_i32_0 = arith.constant 0 : i32
    %c0_i32_1 = arith.constant 0 : i32
    return %c0_i32, %c0_i32_0 : i32, i32
  }
  func.func @transform_6(%arg0: i32) -> (i32, i32) {
    %c0_i32 = arith.constant 0 : i32
    %c0_i32_0 = arith.constant 0 : i32
    %c0_i32_1 = arith.constant 0 : i32
    return %c0_i32, %c0_i32_0 : i32, i32
  }
  func.func @transform_7(%arg0: i32) -> (i32, i32) {
    %c0_i32 = arith.constant 0 : i32
    %c0_i32_0 = arith.constant 0 : i32
    return %c0_i32, %arg0 : i32, i32
  }
}

</mosaic_0001>

<bundles_post_ra>
// kernel: tpu_custom_call.1
= control target key start
LH: loop header
LB: loop body
LE: loop exit
PB: predicated region body
PF: predicated region fallthrough
CT: control target
= control target key end

     0   :  { %s622_s0 = inlined_call_operand.hbm [shape: f32[8,16], index: 0, kind: input, shape index: {}]   ;;  %s623_s1 = inlined_call_operand.hbm [shape: f32[16,32], index: 1, kind: input, shape index: {}]   ;;  %s624_s2 = inlined_call_operand.vmem [shape: f32[1,32], index: 2, kind: input, shape index: {}]   ;;  %s625_s3 = inlined_call_operand.hbm [shape: f32[32,32], index: 3, kind: input, shape index: {}]   ;;  %s626_s4 = inlined_call_operand.vmem [shape: f32[1,32], index: 4, kind: input, shape index: {}]   ;;  %s627_s5 = inlined_call_operand.vmem [shape: f32[1,32], index: 5, kind: input, shape index: {}]   ;;  %s628_s6 = inlined_call_operand.<no memory space> [shape: f32[1,1], index: 6, kind: input, shape index: {}]   ;;  %s629_s7 = inlined_call_operand.hbm [shape: f32[1,8], index: 7, kind: output, shape index: {}]  }
   0x1   :  { %v12_v0 = vstv %s628_s6 }
   0x2   :  { %13 = vst [vmem:[#allocation2] sm:$0x1] %v12_v0 }
   0x3   :  { %14 = vsyncpa [#allocation4], 0 }
   0x4   :  { %15 = vsyncpa [#allocation7], 0 }
   0x5   :  { %16 = vsyncpa [#allocation5], 0  ;;  %s503_s26 = smov [#allocation6]   ;;  %s409_s30 = scalar_lea.hbm %s623_s1, 256 }
   0x6   :  { %s32_s27 = sshll.u32 %s503_s26, 4  ;;  %p410_p0 = scmp.ne.s32.totalorder %s623_s1, %s409_s30  ;;  %s33_s27 = int_to_ptr.vmem [resolvable:$true] %s32_s27 }
   0x7   :  { %p413_p1 = scmp.lt.u32.totalorder %s409_s30, %s623_s1 }
   0x9   :  { %p415_p2 = pnand %p413_p1, %p410_p0 }
   0xb   :  { %418 = shalt.err (!%p415_p2)
}
   0xc   :  { %s419_s6 = scalar_lea.vmem %s33_s27, 256  ;;  %p424_p4 = scmp.lt.s32.totalorder %s33_s27, %s33_s27 }
   0xd   :  { %p420_p3 = scmp.ne.s32.totalorder %s33_s27, %s419_s6  ;;  %p425_p5 = scmp.lt.s32.totalorder %s419_s6, %s419_s6 }
   0xf   :  { %p426_p6 = por %p425_p5, %p424_p4 }
  0x11   :  { %p427_p7 = pnand %p426_p6, %p420_p3 }
  0x13   :  { %430 = shalt.err (!%p427_p7)
}
  0x14   :  { %s504_s12 = smov 128   ;;  %s505_s13 = smov 8  }
  0x15   :  { %38 = dma.hbm_to_vmem [thread:$0]  %s623_s1, 256, %s33_s27, [#allocation7], %s504_s12, %s504_s12, %s505_s13  }
  0x16   :  { %s506_s16 = smov [#allocation3]   ;;  %s507_s18 = smov [#allocation8]  }
  0x17   :  { %s23_s17 = sshll.u32 %s506_s16, 4  ;;  %s46_s19 = sshll.u32 %s507_s18, 4  ;;  %s24_s17 = int_to_ptr.vmem [resolvable:$true] %s23_s17  ;;  %s47_s19 = int_to_ptr.vmem [resolvable:$true] %s46_s19 }
  0x18   :  { %s431_s22 = scalar_lea.hbm %s622_s0, 128 }
  0x19   :  { %p432_p8 = scmp.ne.s32.totalorder %s622_s0, %s431_s22  ;;  %p435_p9 = scmp.lt.u32.totalorder %s431_s22, %s622_s0 }
  0x1b   :  { %p437_p10 = pnand %p435_p9, %p432_p8 }
  0x1d   :  { %440 = shalt.err (!%p437_p10)
}
  0x1e   :  { %s441_s1 = scalar_lea.vmem %s24_s17, 128  ;;  %p446_p12 = scmp.lt.s32.totalorder %s24_s17, %s24_s17 }
  0x1f   :  { %p442_p11 = scmp.ne.s32.totalorder %s24_s17, %s441_s1  ;;  %p447_p13 = scmp.lt.s32.totalorder %s441_s1, %s441_s1 }
  0x21   :  { %p448_p0 = por %p447_p13, %p446_p12 }
  0x23   :  { %p449_p1 = pnand %p448_p0, %p442_p11 }
  0x25   :  { %452 = shalt.err (!%p449_p1)
}
  0x26   :  { %26 = dma.hbm_to_vmem [thread:$0]  %s622_s0, 128, %s24_s17, [#allocation4]  }
  0x27   :  { %s453_s8 = scalar_lea.hbm %s625_s3, 512 }
  0x28   :  { %p454_p2 = scmp.ne.s32.totalorder %s625_s3, %s453_s8  ;;  %p457_p3 = scmp.lt.u32.totalorder %s453_s8, %s625_s3 }
  0x2a   :  { %p459_p4 = pnand %p457_p3, %p454_p2 }
  0x2c   :  { %462 = shalt.err (!%p459_p4)
}
  0x2d   :  { %s463_s14 = scalar_lea.vmem %s47_s19, 512  ;;  %p468_p6 = scmp.lt.s32.totalorder %s47_s19, %s47_s19 }
  0x2e   :  { %p464_p5 = scmp.ne.s32.totalorder %s47_s19, %s463_s14  ;;  %p469_p7 = scmp.lt.s32.totalorder %s463_s14, %s463_s14 }
  0x30   :  { %p470_p8 = por %p469_p7, %p468_p6 }
  0x32   :  { %p471_p9 = pnand %p470_p8, %p464_p5 }
  0x34   :  { %474 = shalt.err (!%p471_p9)
}
  0x35   :  { %52 = dma.hbm_to_vmem [thread:$0]  %s625_s3, 512, %s47_s19, [#allocation7], %s504_s12, %s504_s12, %s505_s13  }
  0x36   :  { %497 = dma.done.wait [#allocation4], 128  }
  0x37   :  { %498 = vsyncadd [#allocation4], 4294967168 }
  0x38   :  { %499 = dma.done.wait [#allocation7], 768  }
  0x39   :  { %500 = vsyncadd [#allocation7], 4294966528  ;;  %v508_v1 = vmov 0.0|0.0   ;;  %vm509_vm0 = vmmov 0   ;;  %v510_v2 = vmov 0.0   ;;  %v69_v3 = vld [vmem:[#allocation6] sm:$0xff]  ;;  %v246_v26 = vlaneseq }
  0x3a   :  { %387 = vmatprep.subr.bf16.mxu0 %v508_v1  ;;  %368 = vmatprep.mubr.msk.f32.mxu0 %vm509_vm0, %v510_v2  ;;  %v70_v4 = vld [vmem:[#allocation6 + $0x8] sm:$0xff]  ;;  %v153_v6 = vld [vmem:[#allocation8] sm:$0xff]  ;;  %v154_v7 = vld [vmem:[#allocation8 + $0x8] sm:$0xff]  ;;  %vm78_vm1 = vcmask 130048   ;;  %vm164_vm2 = vcmask 261120   ;;  %v511_v19 = vmov 0  }
  0x3b   :  { %390 = vmatprep.subr.bf16.mxu1 %v508_v1  ;;  %379 = vmatprep.mubr.msk.f32.mxu1 %vm509_vm0, %v510_v2  ;;  %v388_v5 = vpack.c.bf16 %v70_v4, %v69_v3  ;;  %v391_v8 = vpack.c.bf16 %v154_v7, %v153_v6  ;;  %v68_v9 = vld [vmem:[#allocation3] sm:$0xff]  ;;  %v155_v10 = vld [vmem:[#allocation8 + $0x10] sm:$0xff]  ;;  %v156_v11 = vld [vmem:[#allocation8 + $0x18] sm:$0xff]  ;;  %v247_v27 = vshrl.u32 %v246_v26, 7  ;;  %vm330_vm3 = vcmask 57344  }
  0x3c   :  { %v394_v12 = vpack.c.bf16 %v156_v11, %v155_v10  ;;  %v348_v13 = vld [vmem:[%s624_s2] ss:$0 sm:$0xff]  ;;  %406 = vset.pattern.permute.xlu0 %v511_v19 }
  0x3d   :  { %389 = vmatpush3.bf16.msra.mxu0 %v388_v5  ;;  %392 = vmatpush3.bf16.msra.mxu1 %v391_v8  ;;  %v240_v18 = vld [vmem:[#allocation2] sm:$0x1]  ;;  %v248_v28 = vsub.s32 0, %v247_v27 }
  0x3e   :  { %382 = vmatprep.subr.mxu0 %v510_v2  ;;  %393 = vmatprep.subr.bf16.mxu1 %v508_v1  ;;  %v350_v20 = vld [vmem:[%s626_s4] ss:$0 sm:$0xff]  ;;  %s512_s4 = smov [#allocation9]  }
  0x3f   :  { %243 = vperm.xlu0 %406, %v240_v18   ;;  %v239_v25 = vld [vmem:[%s627_s5] sm:$0x1]  ;;  %s338_s18 = sshll.u32 %s512_s4, 4  ;;  %s339_s18 = int_to_ptr.vmem [resolvable:$true] %s338_s18 }
  0x40   :  { %369 = vmatmul.mubr.msk.f32.vlgmr.msra.gmra.mrb[0].mxu0 %vm78_vm1, %v68_v9  ;;  %s475_s5 = scalar_lea.vmem %s339_s18, 16  ;;  %s479_s19 = scalar_lea.vmem %s339_s18, 32 }
  0x41   :  { %384 = vmatprep.mubr.msk.f32.mxu0 %vm509_vm0, %v510_v2  ;;  %395 = vmatpush3.bf16.msra.mxu1 %v394_v12  ;;  %p476_p10 = scmp.ne.s32.totalorder %s339_s18, %s475_s5  ;;  %p480_p11 = scmp.lt.s32.totalorder %s339_s18, %s339_s18 }
  0x42   :  { %p481_p12 = scmp.lt.s32.totalorder %s479_s19, %s475_s5 }
  0x44   :  { %p482_p13 = por %p481_p12, %p480_p11 }
  0x46   :  { %p483_p0 = pnand %p482_p13, %p476_p10 }
  0xbe   :  { %v244_v29 = vpop.permute.xlu0 %243 }
  0xbf   :  { %v249_v30 = vrot.slane %v244_v29, %v248_v28 }
 0x113   :  { %v148_v14 = vpop.f32.mrb[0].mxu0 }
 0x114   :  { %v149_v15 = vadd.f32 %v348_v13, %v148_v14  ;;  %v370_v16 = vpop.f32.mrb[1].mxu0 }
 0x116   :  { %v152_v17 = vmax.f32 %v149_v15, 0.0 }
 0x118   :  { %380 = vmatmul.mubr.msk.f32.vlgmr.msra.gmra.mrb[0].mxu1 %vm164_vm2, %v152_v17 }
 0x1eb   :  { %v234_v21 = vpop.f32.mrb[0].mxu1 }
 0x1ec   :  { %v235_v22 = vadd.f32 %v350_v20, %v234_v21  ;;  %v381_v23 = vpop.f32.mrb[1].mxu1 }
 0x1ee   :  { %v238_v24 = vmax.f32 %v235_v22, 0.0 }
 0x1f0   :  { %383 = vmatpush3.xpose.msk.msra.mxu0 %vm164_vm2, %v238_v24 }
 0x1f3   :  { %385 = vmatmul.mubr.msk.f32.vlgmr.msra.gmra.mrb[2].mxu0 %vm164_vm2, %v239_v25 }
 0x2c6   :  { %v322_v31 = vpop.f32.mrb[2].mxu0 }
 0x2c7   :  { %v323_v32 = vadd.f32 %v322_v31, %v249_v30  ;;  %v386_v33 = vpop.f32.mrb[3].mxu0 }
 0x2c9   :  { %v326_v34 = vmul.f32 0.5, %v323_v32 }
 0x2cb   :  { %407 = vtanh.f32 %v326_v34 }
 0x2d5   :  { %v408_v35 = vpop.eup %407 }
 0x2d6   :  { %v328_v36 = vmul.f32 0.5, %v408_v35 }
 0x2d8   :  { %v329_v37 = vadd.f32 0.5, %v328_v36 }
 0x2da   :  { %331 = vst.msk [vmem:[#allocation9] sm:$0x1] %vm330_vm3, %v329_v37 }
 0x2db   :  { %486 = shalt.err (!%p483_p0)
}
 0x2dc   :  { %s487_s22 = scalar_lea.hbm %s629_s7, 16 }
 0x2dd   :  { %p488_p1 = scmp.ne.s32.totalorder %s629_s7, %s487_s22  ;;  %p491_p2 = scmp.lt.u32.totalorder %s487_s22, %s629_s7 }
 0x2df   :  { %p493_p3 = pnand %p491_p2, %p488_p1 }
 0x2e1   :  { %496 = shalt.err (!%p493_p3)
}
 0x2e2   :  { %341 = dma.vmem_to_hbm [thread:$0]  %s339_s18, 16, %s629_s7, [#allocation5]  }
 0x2e3   :  { %501 = dma.done.wait [#allocation5], 16  }
 0x2e4   :  { %502 = vsyncadd [#allocation5], 4294967280 }
 0x2e5   :  { %345 = vsyncpa [#allocation4], 1 }
 0x2e6   :  { %346 = vsyncpa [#allocation7], 1 }
 0x2e7   :  { %347 = vsyncpa [#allocation5], 1 }

</bundles_post_ra>
